<compile_context>
chip_gen: v5e
topology: v5e:2x2
jax: 0.10.0
libtpu: 0.0.40
codegen_flags: <defaults>
</compile_context>

<pallas_src>
import functools

import jax
import jax.numpy as jnp
from jax import lax
from jax.experimental import pallas as pl
from jax.experimental.pallas import tpu as pltpu


def _as_i32(v):
    """Reinterpret a uint32 literal as a signed int32 Python int."""
    v &= 0xFFFFFFFF
    return v - (1 << 32) if v >= (1 << 31) else v


_C1 = _as_i32(0x85EBCA6B)
_C2 = _as_i32(0xC2B2AE35)
_GOLDEN = _as_i32(0x9E3779B9)


def _lsr32(x, s):
    """Logical right shift for int32 (arithmetic shift + mask of sign bits)."""
    return (x >> s) & jnp.int32((1 << (32 - s)) - 1)


def _hash_bits(seed, shape):
    """Cheap counter-based hash PRNG (fallback when the TPU HW PRNG is
    unavailable, e.g. CPU/interpret runs).  Returns 31 uniform bits/elem.
    Note: idx wraps mod 2^32 for huge B*n_out; counters stay unique."""
    tb, n = shape
    row0 = pl.program_id(0) * tb
    idx = ((row0 + lax.broadcasted_iota(jnp.int32, shape, 0)) * jnp.int32(n)
           + lax.broadcasted_iota(jnp.int32, shape, 1))
    h = idx * jnp.int32(_C1) ^ (seed * jnp.int32(_GOLDEN))
    h = (h ^ _lsr32(h, 16)) * jnp.int32(_C2)
    h = h ^ _lsr32(h, 15)
    return h & jnp.int32(0x7FFFFFFF)


def _forward(x_ref, w_ref, b_ref, o_ref, seed, *, dropout_p, apply_dropout,
             use_bf16, hw_prng):
    x = x_ref[...]
    w = w_ref[...]
    if use_bf16:
        # Explicit numerics trade-off: bf16 MXU matmul, f32 accumulation.
        # Cast happens in-register (no extra HBM pass over x).
        y = jnp.dot(x.astype(jnp.bfloat16), w,
                    preferred_element_type=jnp.float32)
    else:
        # Full f32 matmul for torch nn.Linear parity; the kernel is mem-bound
        # so the extra MXU passes are invisible.
        y = jnp.dot(x, w, preferred_element_type=jnp.float32,
                    precision=lax.Precision.HIGHEST)
    y = y + b_ref[...]                 # (1, N) bias broadcast
    y = jax.nn.sigmoid(y)              # exp on the EUP slot; cheap filler here

    if apply_dropout:
        if dropout_p >= 1.0:
            y = jnp.zeros_like(y)
        else:
            tb, n = y.shape
            if hw_prng:
                # Hardware PRNG: a handful of ops per vreg instead of ~18
                # int32 VALU ops per element.  Distinct stream per grid step.
                pltpu.prng_seed(seed ^ (pl.program_id(0) * jnp.int32(_GOLDEN)))
                bits = pltpu.prng_random_bits((tb, n))
                if bits.dtype != jnp.int32:
                    bits = pltpu.bitcast(bits, jnp.int32)
                r = bits & jnp.int32(0x7FFFFFFF)   # uniform in [0, 2**31)
            else:
                r = _hash_bits(seed, (tb, n))
            thresh = jnp.int32(min(int(round(dropout_p * 2.0 ** 31)),
                                   2 ** 31 - 1))
            keep = r >= thresh                     # P(keep) = 1 - p
            y = jnp.where(keep, y * (1.0 / (1.0 - dropout_p)), 0.0)

    o_ref[...] = y.astype(o_ref.dtype)


def _kernel_eval(x_ref, w_ref, b_ref, o_ref, *, use_bf16):
    _forward(x_ref, w_ref, b_ref, o_ref, None, dropout_p=0.0,
             apply_dropout=False, use_bf16=use_bf16, hw_prng=False)


def _kernel_train(seed_ref, x_ref, w_ref, b_ref, o_ref, *, dropout_p,
                  use_bf16, hw_prng):
    _forward(x_ref, w_ref, b_ref, o_ref, seed_ref[0], dropout_p=dropout_p,
             apply_dropout=True, use_bf16=use_bf16, hw_prng=hw_prng)


def _num_tensorcores():
    """Best-effort TensorCore count of the first device: 1 on v5e/v6e, 2 on
    megacore chips (v4 / v5p / v7x).  Any failure falls back to 1."""
    try:
        d = jax.devices()[0]
        for attr in ("num_cores", "core_count"):
            nc = getattr(d, attr, None)
            if isinstance(nc, int) and nc > 0:
                return nc
        kind = str(getattr(d, "device_kind", "")).lower()
        if ("v4" in kind) or ("v5p" in kind) or ("7" in kind):
            return 2
    except Exception:
        pass
    return 1


def _pick_block_rows(n_rows, block_rows, bytes_per_row, vmem_budget, min_steps):
    """Pick the largest row tile (multiple of 8) that fits the VMEM budget.
    Only split into several grid steps when the device has >1 TensorCore and
    the problem is big enough to feed both; keep the step count a multiple of
    the core count so megacore stays balanced."""
    if n_rows <= 8:
        return n_rows
    cap = max(8, int(vmem_budget // max(bytes_per_row, 1)) // 8 * 8)
    bb = max(8, (min(block_rows, cap, n_rows) // 8) * 8)
    n_steps = pl.cdiv(n_rows, bb)
    if min_steps > 1 and n_steps < min_steps and n_rows > 8 * min_steps:
        n_steps = min_steps
    if n_steps > 1 and min_steps > 1 and n_steps % min_steps:
        n_steps += min_steps - n_steps % min_steps
    if n_steps > 1:
        bb = max(8, ((pl.cdiv(n_rows, n_steps) + 7) // 8) * 8)
    return min(bb, n_rows)


def lncrna_embedding(x, w, b, *, dropout_p=0.5, training=False, seed=0,
                     block_rows=4096, use_bf16=False, out_dtype=None,
                     vmem_budget_bytes=32 << 20, use_hw_prng=None):
    """Pallas forward for LncRNAEmbedding: dropout(sigmoid(x @ w + b)).

    x: (B, in_feats) float32; w: (in_feats, out_feats) (transpose of torch
    Linear.weight); b: (out_feats,).  `seed` is only used when training with
    dropout_p > 0.  `use_bf16=True` is an explicit numerics trade-off (bf16
    matmul, f32 accumulate); `out_dtype=jnp.bfloat16` halves the dominant
    output-store HBM traffic if downstream consumers accept it.
    """
    B, in_feats = x.shape
    out_feats = w.shape[1]
    out_dtype = x.dtype if out_dtype is None else out_dtype
    if use_hw_prng is None:
        use_hw_prng = jax.default_backend() == "tpu"

    # Lane-dense packing: fold `pack` batch rows into one 128-lane output row.
    # B is zero-padded to a multiple of pack so output stores stay unmasked
    # full-lane; padded rows are sliced off at the end.
    pack = 1
    if 0 < out_feats < 128 and 128 % out_feats == 0:
        pack = 128 // out_feats
    pad = (-B) % pack
    if pad:
        x = jnp.pad(x, ((0, pad), (0, 0)))
    Bp = B + pad
    if pack > 1:
        xp = x.reshape(Bp // pack, in_feats * pack)       # contiguous reshape
        wp = jnp.kron(jnp.eye(pack, dtype=w.dtype), w)    # block-diagonal W
        bp = jnp.tile(b, pack)
    else:
        xp, wp, bp = x, w, b
    bp = bp.reshape(1, -1).astype(jnp.float32)
    if use_bf16:
        wp = wp.astype(jnp.bfloat16)   # tiny & built here anyway; x stays f32
    # NOTE: x is deliberately NOT cast in the wrapper -- that would be an
    # extra full HBM pass over x.  Any cast happens in-register in the kernel.

    n_rows, k = xp.shape
    n_out = wp.shape[1]

    x_row_bytes = k * xp.dtype.itemsize
    out_row_bytes = n_out * jnp.dtype(out_dtype).itemsize
    bytes_per_row = 2 * (x_row_bytes + out_row_bytes)     # double-buffered
    bb = _pick_block_rows(n_rows, block_rows, bytes_per_row,
                          vmem_budget_bytes, _num_tensorcores())
    grid = (pl.cdiv(n_rows, bb),)

    wb_bytes = 2 * (wp.size * wp.dtype.itemsize + bp.size * bp.dtype.itemsize)
    vmem_limit = int(min(max(bb * bytes_per_row + wb_bytes + (4 << 20),
                             16 << 20), 56 << 20))

    # Weight / bias are grid-invariant (constant index_map), so Pallas skips
    # re-DMA across steps.
    # TODO(synk): single-buffer w/b (pipeline_mode=pl.Buffered(1)) if
    # in/out_feats ever grow enough to pressure v7x's 64 MiB VMEM.
    in_specs = [
        pl.BlockSpec((bb, k), lambda i, *_: (i, 0)),
        pl.BlockSpec((k, n_out), lambda i, *_: (0, 0)),
        pl.BlockSpec((1, n_out), lambda i, *_: (0, 0)),
    ]
    out_spec = pl.BlockSpec((bb, n_out), lambda i, *_: (i, 0))

    use_dropout = bool(training) and float(dropout_p) > 0.0
    if use_dropout:
        kernel = functools.partial(_kernel_train, dropout_p=float(dropout_p),
                                   use_bf16=use_bf16,
                                   hw_prng=bool(use_hw_prng))
        n_prefetch = 1
        seed_arr = jnp.asarray(seed, dtype=jnp.int32).reshape((1,))
        args = (seed_arr, xp, wp, bp)
    else:
        kernel = functools.partial(_kernel_eval, use_bf16=use_bf16)
        n_prefetch = 0
        args = (xp, wp, bp)

    out = pl.pallas_call(
        kernel,
        out_shape=jax.ShapeDtypeStruct((n_rows, n_out), out_dtype),
        grid_spec=pltpu.PrefetchScalarGridSpec(
            num_scalar_prefetch=n_prefetch,
            grid=grid,
            in_specs=in_specs,
            out_specs=out_spec,
        ),
        compiler_params=pltpu.CompilerParams(
            dimension_semantics=("parallel",),
            vmem_limit_bytes=vmem_limit,
        ),
    )(*args)

    out = out.reshape(Bp, out_feats) if pack > 1 else out
    return out[:B] if pad else out


if __name__ == "__main__":
    # Small shapes consistent with the module: Linear(in_feats=16, out_feats=32).
    B, IN_FEATS, OUT_FEATS = 64, 16, 32
    DROPOUT_P = 0.5

    key = jax.random.PRNGKey(0)
    kx, kw, kb = jax.random.split(key, 3)

    # Deterministic synthetic params (scale mimics PyTorch's 1/sqrt(in) init).
    bound = 1.0 / (IN_FEATS ** 0.5)
    x = jax.random.normal(kx, (B, IN_FEATS), dtype=jnp.float32)
    w = jax.random.uniform(kw, (IN_FEATS, OUT_FEATS), jnp.float32, -bound, bound)
    b = jax.random.uniform(kb, (OUT_FEATS,), jnp.float32, -bound, bound)

    # Eval-mode forward (dropout == identity), same as module.eval() in PyTorch.
    out = jax.block_until_ready(
        lncrna_embedding(x, w, b, dropout_p=DROPOUT_P, training=False))

    # Pure-JAX f32 reference (full-precision matmul, matching the kernel).
    ref = jax.nn.sigmoid(
        jnp.dot(x, w, precision=lax.Precision.HIGHEST) + b[None, :])
    assert out.shape == (B, OUT_FEATS)
    assert jnp.allclose(out, ref, atol=1e-4, rtol=1e-4), \
        float(jnp.max(jnp.abs(out - ref)))

    # Training-mode path (in-kernel stochastic dropout via the TPU HW PRNG).
    out_train = jax.block_until_ready(
        lncrna_embedding(x, w, b, dropout_p=DROPOUT_P, training=True, seed=123))
    assert out_train.shape == (B, OUT_FEATS)
    kept = out_train != 0.0  # sigmoid output is strictly > 0, so zero == dropped
    # Kept entries are exactly sigmoid(xW+b) / (1-p); dropped entries are 0.
    assert jnp.allclose(jnp.where(kept, out_train * (1.0 - DROPOUT_P), 0.0),
                        jnp.where(kept, ref, 0.0), atol=1e-4, rtol=1e-4)
    keep_frac = float(jnp.mean(kept.astype(jnp.float32)))
    assert 0.35 < keep_frac < 0.65, keep_frac  # ~1-p over 2048 Bernoulli draws

    print("KERNEL_OK")
</pallas_src>

<mosaic_0001>
module attributes {stable_mosaic.version = 11 : i64} {
  func.func @_kernel_eval(%arg0: i32, %arg1: memref<16x64xf32, #tpu.memory_space<vmem>>, %arg2: memref<64x128xf32, #tpu.memory_space<vmem>>, %arg3: memref<1x128xf32, #tpu.memory_space<vmem>>, %arg4: memref<16x128xf32, #tpu.memory_space<vmem>>) attributes {dimension_semantics = [#tpu.dimension_semantics<parallel>], iteration_bounds = array<i64: 1>, scalar_prefetch = 0 : i64, scratch_operands = 0 : i64, tpu.core_type = #tpu.core_type<tc>, window_params = [{transform_indices = @transform_0, window_bounds = array<i64: 16, 64>}, {pipeline_mode = #tpu.pipeline_mode<synchronous>, transform_indices = @transform_1, window_bounds = array<i64: 64, 128>}, {pipeline_mode = #tpu.pipeline_mode<synchronous>, transform_indices = @transform_2, window_bounds = array<i64: 1, 128>}, {transform_indices = @transform_3, window_bounds = array<i64: 16, 128>}]} {
    %c0 = arith.constant 0 : index
    %c0_0 = arith.constant 0 : index
    %0 = vector.load %arg1[%c0, %c0_0] : memref<16x64xf32, #tpu.memory_space<vmem>>, vector<16x64xf32>
    %c0_1 = arith.constant 0 : index
    %c0_2 = arith.constant 0 : index
    %1 = vector.load %arg2[%c0_1, %c0_2] : memref<64x128xf32, #tpu.memory_space<vmem>>, vector<64x128xf32>
    %cst = arith.constant dense<0.000000e+00> : vector<16x128xf32>
    %2 = tpu.matmul %0, %1, %cst {dimension_numbers = #tpu.dot_dimension_numbers<[1], [0], [0], [1], [0, 0, 1, 1], [], []>, precision = #tpu.contract_precision<fp32>} : vector<16x64xf32>, vector<64x128xf32>, vector<16x128xf32> -> vector<16x128xf32>
    %c0_3 = arith.constant 0 : index
    %c0_4 = arith.constant 0 : index
    %3 = vector.load %arg3[%c0_3, %c0_4] : memref<1x128xf32, #tpu.memory_space<vmem>>, vector<1x128xf32>
    %4 = vector.broadcast %3 : vector<1x128xf32> to vector<16x128xf32>
    %5 = arith.addf %2, %4 : vector<16x128xf32>
    %6 = arith.negf %5 : vector<16x128xf32>
    %7 = math.exp %6 : vector<16x128xf32>
    %cst_5 = arith.constant 1.000000e+00 : f32
    %8 = vector.broadcast %cst_5 : f32 to vector<16x128xf32>
    %9 = arith.addf %8, %7 : vector<16x128xf32>
    %10 = arith.divf %8, %9 : vector<16x128xf32>
    %c0_6 = arith.constant 0 : index
    %c0_7 = arith.constant 0 : index
    %11 = vector.load %arg4[%c0_6, %c0_7] : memref<16x128xf32, #tpu.memory_space<vmem>>, vector<16x128xf32>
    tpu.vector_store %arg4[%c0_6, %c0_7], %10 {strides = array<i32>} : memref<16x128xf32, #tpu.memory_space<vmem>>, vector<16x128xf32>,
    return
  }
  func.func @transform_0(%arg0: i32) -> (i32, i32) {
    %c0_i32 = arith.constant 0 : i32
    %c0_i32_0 = arith.constant 0 : i32
    return %arg0, %c0_i32 : i32, i32
  }
  func.func @transform_1(%arg0: i32) -> (i32, i32) {
    %c0_i32 = arith.constant 0 : i32
    %c0_i32_0 = arith.constant 0 : i32
    %c0_i32_1 = arith.constant 0 : i32
    return %c0_i32, %c0_i32_0 : i32, i32
  }
  func.func @transform_2(%arg0: i32) -> (i32, i32) {
    %c0_i32 = arith.constant 0 : i32
    %c0_i32_0 = arith.constant 0 : i32
    %c0_i32_1 = arith.constant 0 : i32
    return %c0_i32, %c0_i32_0 : i32, i32
  }
  func.func @transform_3(%arg0: i32) -> (i32, i32) {
    %c0_i32 = arith.constant 0 : i32
    %c0_i32_0 = arith.constant 0 : i32
    return %arg0, %c0_i32 : i32, i32
  }
}

</mosaic_0001>

<bundles_post_ra>
// kernel: tpu_custom_call.1
= control target key start
LH: loop header
LB: loop body
LE: loop exit
PB: predicated region body
PF: predicated region fallthrough
CT: control target
= control target key end

     0   :  { %8 = vsyncpa [#allocation3], 0  ;;  %s657_s0 = inlined_call_operand.hbm [shape: f32[16,64], index: 0, kind: input, shape index: {}]   ;;  %s658_s1 = inlined_call_operand.hbm [shape: f32[64,128], index: 1, kind: input, shape index: {}]   ;;  %s659_s2 = inlined_call_operand.vmem [shape: f32[1,128], index: 2, kind: input, shape index: {}]   ;;  %s660_s3 = inlined_call_operand.hbm [shape: f32[16,128], index: 3, kind: output, shape index: {}]  }
   0x1   :  { %9 = vsyncpa [#allocation6], 0 }
   0x2   :  { %10 = vsyncpa [#allocation4], 0  ;;  %s15_s14 = sshll.u32 %s657_s0, 4  ;;  %s506_s15 = smov [#allocation2]   ;;  %s16_s14 = int_to_ptr.hbm [resolvable:$true] %s15_s14 }
   0x3   :  { %s17_s16 = sshll.u32 %s506_s15, 4  ;;  %s28_s19 = sshll.u32 %s658_s1, 4  ;;  %s18_s16 = int_to_ptr.vmem [resolvable:$true] %s17_s16  ;;  %s29_s19 = int_to_ptr.hbm [resolvable:$true] %s28_s19 }
   0x4   :  { %s507_s20 = smov 128   ;;  %s508_s21 = smov 8  }
   0x5   :  { %23 = dma.hbm_to_vmem [thread:$0]  %s16_s14, 256, %s18_s16, [#allocation3], %s507_s20, %s507_s20, %s508_s21  }
   0x6   :  { %s509_s22 = smov [#allocation5]  }
   0x7   :  { %s30_s23 = sshll.u32 %s509_s22, 4  ;;  %s31_s23 = int_to_ptr.vmem [resolvable:$true] %s30_s23 }
   0x8   :  { %36 = dma.hbm_to_vmem [thread:$0]  %s29_s19, 1024, %s31_s23, [#allocation6], %s507_s20, %s507_s20, %s508_s21  }
   0x9   :  { %500 = dma.done.wait [#allocation3], 256  }
   0xa   :  { %501 = vsyncadd [#allocation3], 4294967040 }
   0xb   :  { %502 = dma.done.wait [#allocation6], 1024  }
   0xc   :  { %503 = vsyncadd [#allocation6], 4294966272  ;;  %v56_v0 = vld [vmem:[#allocation5 + $0x38] sm:$0xff]  ;;  %v55_v1 = vld [vmem:[#allocation5 + $0x30] sm:$0xff]  ;;  %vm61_vm0 = vcmask 523264   ;;  %s382_s27 = sshll.u32 %s660_s3, 4  ;;  %s383_s27 = int_to_ptr.hbm [resolvable:$true] %s382_s27 }
   0xd   :  { %v54_v2 = vld [vmem:[#allocation5 + $0x28] sm:$0xff]  ;;  %v543_v3 = vand.u32 4294901760, %v56_v0  ;;  %v545_v4 = vand.u32 4294901760, %v55_v1  ;;  %v53_v6 = vld [vmem:[#allocation5 + $0x20] sm:$0xff]  ;;  %v52_v7 = vld [vmem:[#allocation5 + $0x18] sm:$0xff] }
   0xe   :  { %v547_v5 = vand.u32 4294901760, %v54_v2  ;;  %v51_v8 = vld [vmem:[#allocation5 + $0x10] sm:$0xff]  ;;  %v549_v9 = vand.u32 4294901760, %v53_v6  ;;  %v551_v10 = vand.u32 4294901760, %v52_v7  ;;  %v50_v12 = vld [vmem:[#allocation5 + $0x8] sm:$0xff]  ;;  %v49_v13 = vld [vmem:[#allocation5] sm:$0xff] }
   0xf   :  { %v553_v11 = vand.u32 4294901760, %v51_v8  ;;  %77 = vmatpush.msra.mxu0 %v543_v3  ;;  %v118_v14 = vsub.f32 %v56_v0, %v543_v3  ;;  %v124_v15 = vsub.f32 %v55_v1, %v545_v4  ;;  %226 = vmatpush.msra.mxu3 %v543_v3  ;;  %v560_v17 = vand.u32 4294901760, %v50_v12  ;;  %v47_v18 = vld [vmem:[#allocation2] sm:$0xff]  ;;  %v48_v36 = vld [vmem:[#allocation2 + $0x8] sm:$0xff] }
  0x10   :  { %v130_v16 = vsub.f32 %v54_v2, %v547_v5  ;;  %v136_v19 = vsub.f32 %v53_v6, %v549_v9  ;;  %v142_v20 = vsub.f32 %v52_v7, %v551_v10  ;;  %v564_v21 = vand.u32 4294901760, %v49_v13  ;;  %v419_v63 = vld [vmem:[%s659_s2] ss:$0 sm:$0xff]  ;;  %s510_s2 = smov [#allocation7]  }
  0x11   :  { %79 = vmatpush.msra.mxu0 %v545_v4  ;;  %184 = vmatpush.msra.mxu2 %v118_v14  ;;  %v567_v22 = vand.u32 4294901760, %v118_v14  ;;  %v569_v23 = vand.u32 4294901760, %v124_v15  ;;  %v148_v25 = vsub.f32 %v51_v8, %v553_v11  ;;  %v154_v27 = vsub.f32 %v50_v12, %v560_v17  ;;  %s380_s24 = sshll.u32 %s510_s2, 4  ;;  %s381_s24 = int_to_ptr.vmem [resolvable:$true] %s380_s24 }
  0x12   :  { %v571_v24 = vand.u32 4294901760, %v130_v16  ;;  %228 = vmatpush.msra.mxu3 %v545_v4  ;;  %v575_v26 = vand.u32 4294901760, %v136_v19  ;;  %v63_v28 = vsel %vm61_vm0, %v47_v18, 0  ;;  %v579_v29 = vand.u32 4294901760, %v142_v20 }
  0x13   :  { %81 = vmatpush.msra.mxu0 %v547_v5  ;;  %187 = vmatpush.msra.mxu2 %v124_v15  ;;  %v120_v30 = vsub.f32 %v118_v14, %v567_v22  ;;  %v126_v31 = vsub.f32 %v124_v15, %v569_v23  ;;  %v585_v33 = vand.u32 4294901760, %v63_v28  ;;  %v160_v35 = vsub.f32 %v49_v13, %v564_v21 }
  0x14   :  { %v132_v32 = vsub.f32 %v130_v16, %v571_v24  ;;  %230 = vmatpush.msra.mxu3 %v547_v5  ;;  %v138_v34 = vsub.f32 %v136_v19, %v575_v26  ;;  %v592_v40 = vand.u32 4294901760, %v148_v25  ;;  %v144_v41 = vsub.f32 %v142_v20, %v579_v29 }
  0x15   :  { %83 = vmatpush.msra.mxu0 %v549_v9  ;;  %190 = vmatpush.msra.mxu2 %v130_v16  ;;  %v121_v37 = vand.u32 4294901760, %v120_v30  ;;  %v127_v38 = vand.u32 4294901760, %v126_v31  ;;  %v93_v39 = vsub.f32 %v63_v28, %v585_v33  ;;  %v597_v44 = vand.u32 4294901760, %v154_v27 }
  0x16   :  { %232 = vmatpush.msra.mxu3 %v549_v9  ;;  %v133_v42 = vand.u32 4294901760, %v132_v32  ;;  %v66_v45 = vsel %vm61_vm0, %v48_v36, 0  ;;  %v139_v47 = vand.u32 4294901760, %v138_v34  ;;  %v150_v49 = vsub.f32 %v148_v25, %v592_v40 }
  0x17   :  { %85 = vmatpush.msra.mxu0 %v551_v10  ;;  %122 = vmatpush.msra.mxu1 %v121_v37  ;;  %v94_v43 = vand.u32 4294901760, %v93_v39  ;;  %v601_v46 = vand.u32 4294901760, %v66_v45  ;;  %v161_v50 = vand.u32 4294901760, %v160_v35  ;;  %v145_v53 = vand.u32 4294901760, %v144_v41 }
  0x18   :  { %193 = vmatpush.msra.mxu2 %v136_v19  ;;  %234 = vmatpush.msra.mxu3 %v551_v10  ;;  %v156_v54 = vsub.f32 %v154_v27, %v597_v44  ;;  %v151_v56 = vand.u32 4294901760, %v150_v49 }
  0x19   :  { %87 = vmatpush.msra.mxu0 %v553_v11  ;;  %128 = vmatpush.msra.mxu1 %v127_v38  ;;  %v95_v48 = vsub.f32 %v93_v39, %v94_v43  ;;  %v101_v51 = vsub.f32 %v66_v45, %v601_v46  ;;  %v162_v57 = vsub.f32 %v160_v35, %v161_v50 }
  0x1a   :  { %196 = vmatpush.msra.mxu2 %v142_v20  ;;  %236 = vmatpush.msra.mxu3 %v553_v11  ;;  %v157_v58 = vand.u32 4294901760, %v156_v54 }
  0x1b   :  { %89 = vmatpush.msra.mxu0 %v560_v17  ;;  %134 = vmatpush.msra.mxu1 %v133_v42  ;;  %v96_v52 = vand.u32 4294901760, %v95_v48  ;;  %v102_v55 = vand.u32 4294901760, %v101_v51  ;;  %v163_v60 = vand.u32 4294901760, %v162_v57 }
  0x1c   :  { %199 = vmatpush.msra.mxu2 %v148_v25  ;;  %238 = vmatpush.msra.mxu3 %v560_v17 }
  0x1d   :  { %91 = vmatpush.msra.mxu0 %v564_v21  ;;  %140 = vmatpush.msra.mxu1 %v139_v47  ;;  %v103_v59 = vsub.f32 %v101_v51, %v102_v55 }
  0x1e   :  { %202 = vmatpush.msra.mxu2 %v154_v27  ;;  %97 = vmatmul.f32.vlgmr.msra.gmra.mxu0 %v96_v52 }
  0x1f   :  { %146 = vmatpush.msra.mxu1 %v145_v53  ;;  %265 = vmatpush.msrb.mxu0 %v567_v22  ;;  %v104_v61 = vand.u32 4294901760, %v103_v59 }
  0x20   :  { %205 = vmatpush.msra.mxu2 %v160_v35  ;;  %240 = vmatpush.msra.mxu3 %v564_v21 }
  0x21   :  { %208 = vmatmul.f32.vlgmr.msra.gmra.mxu2 %v93_v39  ;;  %152 = vmatpush.msra.mxu1 %v151_v56 }
  0x22   :  { %398 = vmatpush.msrb.mxu2 %v567_v22  ;;  %269 = vmatpush.msrb.mxu0 %v569_v23 }
  0x23   :  { %244 = vmatmul.f32.vlgmr.msra.gmra.mxu3 %v94_v43  ;;  %158 = vmatpush.msra.mxu1 %v157_v58 }
  0x24   :  { %399 = vmatpush.msrb.mxu2 %v569_v23  ;;  %406 = vmatpush.msrb.mxu3 %v543_v3 }
  0x25   :  { %273 = vmatpush.msrb.mxu0 %v571_v24  ;;  %164 = vmatpush.msra.mxu1 %v163_v60 }
  0x26   :  { %400 = vmatpush.msrb.mxu2 %v571_v24  ;;  %407 = vmatpush.msrb.mxu3 %v545_v4 }
  0x27   :  { %277 = vmatpush.msrb.mxu0 %v575_v26  ;;  %166 = vmatmul.f32.vlgmr.msra.gmra.mxu1 %v585_v33 }
  0x28   :  { %105 = vmatmul.f32.gmra.mxu0 %v104_v61  ;;  %401 = vmatpush.msrb.mxu2 %v575_v26 }
  0x29   :  { %408 = vmatpush.msrb.mxu3 %v547_v5  ;;  %281 = vmatpush.msrb.mxu0 %v579_v29 }
  0x2a   :  { %312 = vmatpush.msrb.mxu1 %v543_v3  ;;  %213 = vmatmul.f32.gmra.mxu2 %v101_v51 }
  0x2b   :  { %402 = vmatpush.msrb.mxu2 %v579_v29  ;;  %409 = vmatpush.msrb.mxu3 %v549_v9 }
  0x2c   :  { %285 = vmatpush.msrb.mxu0 %v592_v40  ;;  %314 = vmatpush.msrb.mxu1 %v545_v4 }
  0x2d   :  { %250 = vmatmul.f32.gmra.mxu3 %v102_v55  ;;  %403 = vmatpush.msrb.mxu2 %v592_v40 }
  0x2e   :  { %410 = vmatpush.msrb.mxu3 %v551_v10  ;;  %289 = vmatpush.msrb.mxu0 %v597_v44 }
  0x2f   :  { %316 = vmatpush.msrb.mxu1 %v547_v5  ;;  %404 = vmatpush.msrb.mxu2 %v597_v44 }
  0x30   :  { %411 = vmatpush.msrb.mxu3 %v553_v11  ;;  %293 = vmatpush.msrb.mxu0 %v161_v50 }
  0x31   :  { %318 = vmatpush.msrb.mxu1 %v549_v9  ;;  %405 = vmatpush.msrb.mxu2 %v161_v50 }
  0x32   :  { %170 = vmatmul.f32.gmra.mxu1 %v601_v46  ;;  %295 = vmatmul.f32.vlgmr.msrb.gmra.mxu0 %v585_v33 }
  0x33   :  { %412 = vmatpush.msrb.mxu3 %v560_v17  ;;  %320 = vmatpush.msrb.mxu1 %v551_v10 }
  0x34   :  { %299 = vmatmul.f32.vlgmr.msrb.gmra.mxu2 %v601_v46 }
  0x35   :  { %413 = vmatpush.msrb.mxu3 %v564_v21  ;;  %322 = vmatpush.msrb.mxu1 %v553_v11 }
  0x36   :  { %332 = vmatmul.f32.vlgmr.msrb.gmra.mxu3 %v601_v46 }
  0x37   :  { %324 = vmatpush.msrb.mxu1 %v560_v17 }
  0x39   :  { %326 = vmatpush.msrb.mxu1 %v564_v21 }
  0x3a   :  { %328 = vmatmul.f32.vlgmr.msrb.gmra.mxu1 %v585_v33 }
  0x9b   :  { %v98_v62 = vpop.f32.mrf.mxu0 }
  0x9c   :  { %v99_v3 = vadd.f32 %v419_v63, %v98_v62 }
  0xa4   :  { %v209_v0 = vpop.f32.mrf.mxu2  ;;  %v167_v1 = vpop.f32.mrf.mxu1 }
  0xa5   :  { %v106_v4 = vpop.f32.mrf.mxu0  ;;  %v168_v6 = vadd.f32 %v167_v1, %v99_v3 }
  0xa6   :  { %v245_v2 = vpop.f32.mrf.mxu3  ;;  %v107_v5 = vadd.f32 %v419_v63, %v106_v4 }
  0xa7   :  { %v210_v9 = vadd.f32 %v209_v0, %v168_v6 }
  0xa9   :  { %v246_v14 = vadd.f32 %v245_v2, %v210_v9 }
  0xad   :  { %v214_v7 = vpop.f32.mrf.mxu2 }
  0xaf   :  { %v171_v8 = vpop.f32.mrf.mxu1  ;;  %v296_v13 = vpop.f32.mrf.mxu0 }
  0xb0   :  { %v172_v10 = vadd.f32 %v171_v8, %v107_v5  ;;  %v251_v11 = vpop.f32.mrf.mxu3  ;;  %v297_v15 = vadd.f32 %v296_v13, %v246_v14 }
  0xb2   :  { %v215_v12 = vadd.f32 %v214_v7, %v172_v10 }
  0xb4   :  { %v252_v16 = vadd.f32 %v251_v11, %v215_v12 }
  0xb7   :  { %v300_v17 = vpop.f32.mrf.mxu2  ;;  %v329_v18 = vpop.f32.mrf.mxu1 }
  0xb8   :  { %v301_v19 = vadd.f32 %v300_v17, %v252_v16  ;;  %v330_v20 = vadd.f32 %v329_v18, %v297_v15 }
  0xb9   :  { %v333_v21 = vpop.f32.mrf.mxu3 }
  0xba   :  { %v396_v22 = vmul.f32 -1.442695, %v330_v20  ;;  %v334_v23 = vadd.f32 %v333_v21, %v301_v19 }
  0xbc   :  { %420 = vpow2.f32 %v396_v22  ;;  %v397_v24 = vmul.f32 -1.442695, %v334_v23 }
  0xbe   :  { %422 = vpow2.f32 %v397_v24 }
  0xc2   :  { %v421_v25 = vpop.eup %420 }
  0xc3   :  { %v342_v26 = vadd.f32 1.0, %v421_v25 }
  0xc4   :  { %v423_v27 = vpop.eup %422 }
  0xc5   :  { %424 = vrcp.f32 %v342_v26  ;;  %v343_v28 = vadd.f32 1.0, %v423_v27  ;;  %v355_v34 = vand.u32 2147483648, %v342_v26  ;;  %v353_v37 = vand.u32 2147483647, %v342_v26 }
  0xc6   :  { %vm349_vm2 = vweird.f32 %v342_v26 }
  0xc7   :  { %426 = vrcp.f32 %v343_v28  ;;  %v370_v38 = vand.u32 2147483648, %v343_v28  ;;  %v368_v41 = vand.u32 2147483647, %v343_v28  ;;  %v356_v42 = vor.u32 1.1754944e-38, %v355_v34 }
  0xc8   :  { %vm354_vm5 = vcmp.eq.f32.partialorder %v353_v37, 8.507059e+37  ;;  %vm364_vm6 = vweird.f32 %v343_v28 }
  0xc9   :  { %v371_v46 = vor.u32 1.1754944e-38, %v370_v38  ;;  %vm369_vm8 = vcmp.eq.f32.partialorder %v368_v41, 8.507059e+37 }
  0xcb   :  { %v425_v29 = vpop.eup %424 }
  0xcc   :  { %v345_v30 = vmul.f32 %v425_v29, %v342_v26  ;;  %vm350_vm1 = vweird.f32 %v425_v29 }
  0xcd   :  { %v427_v31 = vpop.eup %426  ;;  %vm351_vm4 = vmor %vm349_vm2, %vm350_vm1 }
  0xce   :  { %v346_v32 = vsub.f32 1.0, %v345_v30  ;;  %v360_v33 = vmul.f32 %v427_v31, %v343_v28  ;;  %vm365_vm3 = vweird.f32 %v427_v31 }
  0xcf   :  { %vm366_vm7 = vmor %vm364_vm6, %vm365_vm3 }
  0xd0   :  { %v361_v35 = vsub.f32 1.0, %v360_v33  ;;  %v347_v36 = vmul.f32 %v425_v29, %v346_v32 }
  0xd2   :  { %v348_v39 = vadd.f32 %v425_v29, %v347_v36  ;;  %v362_v40 = vmul.f32 %v427_v31, %v361_v35 }
  0xd4   :  { %v352_v43 = vsel %vm351_vm4, %v425_v29, %v348_v39  ;;  %v363_v44 = vadd.f32 %v427_v31, %v362_v40 }
  0xd5   :  { %v357_v45 = vsel %vm354_vm5, %v356_v42, %v352_v43 }
  0xd6   :  { %v367_v47 = vsel %vm366_vm7, %v427_v31, %v363_v44  ;;  %374 = vst [vmem:[#allocation7] sm:$0xff] %v357_v45 }
  0xd7   :  { %v372_v48 = vsel %vm369_vm8, %v371_v46, %v367_v47 }
  0xd8   :  { %375 = vst [vmem:[#allocation7 + $0x8] sm:$0xff] %v372_v48 }
  0xd9   :  { %388 = dma.vmem_to_hbm [thread:$0]  %s381_s24, 256, %s383_s27, [#allocation4], %s507_s20, %s507_s20, %s508_s21  }
  0xda   :  { %504 = dma.done.wait [#allocation4], 256  }
  0xdb   :  { %505 = vsyncadd [#allocation4], 4294967040 }
  0xdc   :  { %393 = vsyncpa [#allocation3], 1 }
  0xdd   :  { %394 = vsyncpa [#allocation6], 1 }
  0xde   :  { %395 = vsyncpa [#allocation4], 1 }

</bundles_post_ra>
